<compile_context>
chip_gen: v7x
topology: tpu7x:2x2x1
jax: 0.10.0
libtpu: 0.0.40
codegen_flags: <defaults>
</compile_context>

<pallas_src>
import jax
import jax.numpy as jnp
from jax.experimental import pallas as pl
from jax.experimental.pallas import tpu as pltpu


NTYPES = ("vul", "code")
# (srctype, etype, dsttype) -- mirrors G.canonical_etypes.  Only edge types
# whose name contains 'of' participate in FirstLayer's message passing.
CANONICAL_ETYPES = (
    ("code", "part_of", "vul"),
    ("vul", "child_of", "vul"),
    ("vul", "contains", "code"),   # no 'of' -> ignored by the reference forward
)


# ------------------------------ Pallas kernel ------------------------------

def _make_mean_stack_kernel(num_rel):
    """grid = (dst tile i, relation r, src tile k); k and r are reductions.

    refs: a_ref (tm, tk) adjacency tile, x_ref (tk, D) source-feature tile,
          o_ref (tm, D) output tile,
          acc_ref (tm, D) f32 cross-relation accumulator,
          part_ref (tm, D) f32 per-relation partial sum,
          deg_ref (tm, 1)  f32 per-relation in-degree accumulator.
    """
    inv_r = 1.0 / float(num_rel)

    def kernel(a_ref, x_ref, o_ref, acc_ref, part_ref, deg_ref):
        r = pl.program_id(1)
        k = pl.program_id(2)
        last_k = pl.num_programs(2) - 1

        @pl.when((r == 0) & (k == 0))
        def _init_acc():
            acc_ref[...] = jnp.zeros_like(acc_ref)

        @pl.when(k == 0)
        def _init_rel():
            part_ref[...] = jnp.zeros_like(part_ref)
            deg_ref[...] = jnp.zeros_like(deg_ref)

        a = a_ref[...]                                              # (tm, tk) bf16
        # In-degree summed across ALL src tiles of this relation (XLU reduce).
        deg_ref[...] += jnp.sum(a.astype(jnp.float32), axis=-1, keepdims=True)
        # One MXU matmul per grid step, f32 accumulation.
        part_ref[...] += jnp.dot(a, x_ref[...],
                                 preferred_element_type=jnp.float32)

        @pl.when(k == last_k)
        def _finish_rel():
            # fn.mean + 'stack' cross-reducer mean: scale the relation's
            # full-K sum by (1/num_rel)/deg.  Exact reciprocal; zero-in-degree
            # rows stay 0 (their sum is 0), matching DGL.
            scale = inv_r / jnp.maximum(deg_ref[...], 1.0)          # (tm, 1)
            acc_ref[...] += part_ref[...] * scale

        @pl.when((r == num_rel - 1) & (k == last_k))
        def _write_out():
            o_ref[...] = acc_ref[...].astype(o_ref.dtype)

    return kernel


def _round_up(x, m):
    return ((x + m - 1) // m) * m


def mean_stack_aggregate(adjs, xs, *, tm=256, tk=512,
                         compute_dtype=jnp.bfloat16):
    """h[dst] = mean_r( mean_{src in N_r(dst)} x_r[src] ) as one pallas_call.

    adjs[r]: (Nd, Ns_r) 0/1 adjacency, adj[dst, src].  xs[r]: (Ns_r, D).
    """
    assert len(adjs) == len(xs) and len(adjs) >= 1
    num_rel = len(adjs)
    nd = adjs[0].shape[0]
    d = xs[0].shape[1]
    ns_max = max(a.shape[1] for a in adjs)

    # Lane/sublane-aligned padded layout.  Zero padding is exact for both the
    # neighbour sums and the degrees; padded dst rows are sliced off below.
    tm = min(tm, _round_up(nd, 8))
    tk = min(tk, _round_up(ns_max, 128))
    nd_p = _round_up(nd, tm)
    ns_p = _round_up(ns_max, tk)
    d_p = _round_up(d, 128)

    a_cat = jnp.zeros((num_rel, nd_p, ns_p), compute_dtype)
    x_cat = jnp.zeros((num_rel, ns_p, d_p), compute_dtype)
    for r_idx, (a, x) in enumerate(zip(adjs, xs)):
        a_cat = a_cat.at[r_idx, : a.shape[0], : a.shape[1]].set(
            a.astype(compute_dtype))
        x_cat = x_cat.at[r_idx, : x.shape[0], : x.shape[1]].set(
            x.astype(compute_dtype))

    grid = (nd_p // tm, num_rel, ns_p // tk)
    itemsize = a_cat.dtype.itemsize
    cost = pl.CostEstimate(
        flops=2 * num_rel * nd_p * ns_p * d_p,
        transcendentals=0,
        bytes_accessed=(a_cat.size + x_cat.size) * itemsize + nd_p * d_p * 4,
    )

    out = pl.pallas_call(
        _make_mean_stack_kernel(num_rel),
        out_shape=jax.ShapeDtypeStruct((nd_p, d_p), jnp.float32),
        grid_spec=pltpu.PrefetchScalarGridSpec(
            num_scalar_prefetch=0,
            grid=grid,
            in_specs=[
                pl.BlockSpec((None, tm, tk), lambda i, r, k: (r, i, k)),
                pl.BlockSpec((None, tk, d_p), lambda i, r, k: (r, k, 0)),
            ],
            out_specs=pl.BlockSpec((tm, d_p), lambda i, r, k: (i, 0)),
            scratch_shapes=[
                pltpu.VMEM((tm, d_p), jnp.float32),   # cross-relation acc
                pltpu.VMEM((tm, d_p), jnp.float32),   # per-relation partial
                pltpu.VMEM((tm, 1), jnp.float32),     # per-relation in-degree
            ],
        ),
        compiler_params=pltpu.CompilerParams(
            dimension_semantics=("parallel", "arbitrary", "arbitrary")),
        cost_estimate=cost,
    )(a_cat, x_cat)
    return out[:nd, :d]


# ---------------------------- FirstLayer forward ----------------------------

def first_layer_forward(params, graph, feat_dict, *, tm=256, tk=512,
                        compute_dtype=jnp.bfloat16):
    """Pallas port of FirstLayer.forward.

    `params["weight"]` mirrors the nn.Linear ModuleDict but (matching the
    reference forward) is never applied.  Node features 'x' come from
    `feat_dict`; `graph` = {"ntypes", "canonical_etypes", "adj": {etype: A}}.
    """
    del params  # self.weight is not used by the reference forward.
    out = {}
    for nt in graph["ntypes"]:
        if nt == "vul":
            adjs, xs = [], []
            for (src, e, dst) in graph["canonical_etypes"]:
                if "of" in e and dst == nt:
                    adjs.append(graph["adj"][e])
                    xs.append(feat_dict[src])
            out[nt] = mean_stack_aggregate(adjs, xs, tm=tm, tk=tk,
                                           compute_dtype=compute_dtype)
        else:
            out[nt] = feat_dict[nt]                    # apply_nodes: h = x
    return out


def _reference_forward(graph, feat_dict):
    """Pure-JAX (non-Pallas) reference of FirstLayer.forward."""
    out = {}
    for nt in graph["ntypes"]:
        if nt == "vul":
            ms = []
            for (src, e, dst) in graph["canonical_etypes"]:
                if "of" in e and dst == nt:
                    a = graph["adj"][e]
                    deg = jnp.maximum(jnp.sum(a, axis=1, keepdims=True), 1.0)
                    s = jnp.dot(a, feat_dict[src],
                                precision=jax.lax.Precision.HIGHEST)
                    ms.append(s / deg)
            out[nt] = jnp.mean(jnp.stack(ms, axis=1), axis=1)
        else:
            out[nt] = feat_dict[nt]
    return out


# ---------------------------------- demo ----------------------------------

if __name__ == "__main__":
    key = jax.random.PRNGKey(0)
    k1, k2, kw = jax.random.split(key, 3)

    def build_graph(k, num_nodes, in_dim):
        k_feat, k_adj = jax.random.split(k)
        fk = jax.random.split(k_feat, len(NTYPES))
        feat = {nt: jax.random.normal(fk[i], (num_nodes[nt], in_dim),
                                      dtype=jnp.float32)
                for i, nt in enumerate(NTYPES)}
        ak = jax.random.split(k_adj, len(CANONICAL_ETYPES))
        adj = {}
        for i, (src, e, dst) in enumerate(CANONICAL_ETYPES):
            nd_, ns_ = num_nodes[dst], num_nodes[src]
            adj[e] = (jax.random.uniform(ak[i], (nd_, ns_)) > 0.5).astype(jnp.float32)
        graph = {"ntypes": NTYPES, "canonical_etypes": CANONICAL_ETYPES,
                 "adj": adj}
        return graph, feat

    # self.weight = ModuleDict({etype: nn.Linear(in_size, out_size)}).  The
    # reference forward never applies it; kept only for structural parity.
    in_dim, out_dim = 128, 64
    etypes = sorted({e for _, e, _ in CANONICAL_ETYPES})
    wk = jax.random.split(kw, len(etypes))
    w_scale = (2.0 / (in_dim + out_dim)) ** 0.5
    params = {"weight": {e: {"w": w_scale * jax.random.normal(
                                     wk[i], (out_dim, in_dim), jnp.float32),
                             "b": jnp.zeros((out_dim,), jnp.float32)}
                         for i, e in enumerate(etypes)}}

    # --- demo-sized graph (grid = (1, 2, 1)) -------------------------------
    num_nodes = {"vul": 8, "code": 8}
    graph, feat = build_graph(k1, num_nodes, in_dim)

    out = first_layer_forward(params, graph, feat)
    out = jax.block_until_ready(out)

    # Parity reference on the same bf16-rounded operands (f32 math), plus a
    # looser semantic check against the true-f32 reference.
    feat_bf = {nt: f.astype(jnp.bfloat16).astype(jnp.float32)
               for nt, f in feat.items()}
    ref_bf = _reference_forward(graph, feat_bf)
    ref_f32 = _reference_forward(graph, feat)

    assert out["vul"].shape == (num_nodes["vul"], in_dim)
    assert out["code"].shape == (num_nodes["code"], in_dim)
    assert bool(jnp.all(jnp.isfinite(out["vul"])))
    assert bool(jnp.allclose(out["vul"], ref_bf["vul"], rtol=1e-3, atol=1e-3))
    assert bool(jnp.allclose(out["vul"], ref_f32["vul"], rtol=2e-2, atol=2e-2))
    assert bool(jnp.allclose(out["code"], ref_f32["code"]))

    # --- larger graph: multiple dst (M) and src (K) tiles, exercising the
    # cross-tile degree accumulation and pl.when init/finalize paths. --------
    num_nodes2 = {"vul": 48, "code": 300}
    graph2, feat2 = build_graph(k2, num_nodes2, 256)
    out2 = first_layer_forward(params, graph2, feat2, tm=16, tk=128)
    out2 = jax.block_until_ready(out2)

    feat2_bf = {nt: f.astype(jnp.bfloat16).astype(jnp.float32)
                for nt, f in feat2.items()}
    ref2_bf = _reference_forward(graph2, feat2_bf)
    assert out2["vul"].shape == (num_nodes2["vul"], 256)
    assert bool(jnp.allclose(out2["vul"], ref2_bf["vul"], rtol=1e-3, atol=1e-3))
    assert bool(jnp.allclose(out2["code"], feat2["code"]))

    print("KERNEL_OK")
</pallas_src>

<mosaic_0001>
module attributes {stable_mosaic.version = 11 : i64} {
  func.func @kernel(%arg0: i32, %arg1: i32, %arg2: i32, %arg3: memref<1x8x128xbf16, #tpu.memory_space<vmem>>, %arg4: memref<1x128x128xbf16, #tpu.memory_space<vmem>>, %arg5: memref<8x128xf32, #tpu.memory_space<vmem>>, %arg6: memref<8x128xf32, #tpu.memory_space<vmem>>, %arg7: memref<8x128xf32, #tpu.memory_space<vmem>>, %arg8: memref<8x1xf32, #tpu.memory_space<vmem>>) attributes {dimension_semantics = [#tpu.dimension_semantics<parallel>, #tpu.dimension_semantics<arbitrary>, #tpu.dimension_semantics<arbitrary>], iteration_bounds = array<i64: 1, 2, 1>, scalar_prefetch = 0 : i64, scratch_operands = 3 : i64, tpu.core_type = #tpu.core_type<tc>, window_params = [{transform_indices = @transform_0, window_bounds = array<i64: 1, 8, 128>}, {transform_indices = @transform_1, window_bounds = array<i64: 1, 128, 128>}, {transform_indices = @transform_2, window_bounds = array<i64: 8, 128>}]} {
    %c0_i32 = arith.constant 0 : i32
    %0 = arith.cmpi eq, %arg1, %c0_i32 : i32
    %c0_i32_0 = arith.constant 0 : i32
    %1 = arith.cmpi eq, %arg2, %c0_i32_0 : i32
    %2 = arith.andi %0, %1 : i1
    %3 = arith.extui %2 : i1 to i32
    %c0_i32_1 = arith.constant 0 : i32
    %4 = arith.cmpi ne, %3, %c0_i32_1 : i32
    scf.if %4 {
      %cst_22 = arith.constant 0.000000e+00 : f32
      %30 = vector.broadcast %cst_22 : f32 to vector<8x128xf32>
      %c0_23 = arith.constant 0 : index
      %c0_24 = arith.constant 0 : index
      %31 = vector.load %arg6[%c0_23, %c0_24] : memref<8x128xf32, #tpu.memory_space<vmem>>, vector<8x128xf32>
      tpu.vector_store %arg6[%c0_23, %c0_24], %30 {strides = array<i32>} : memref<8x128xf32, #tpu.memory_space<vmem>>, vector<8x128xf32>,
    } else {
    }
    %c0_i32_2 = arith.constant 0 : i32
    %5 = arith.cmpi eq, %arg2, %c0_i32_2 : i32
    %6 = arith.extui %5 : i1 to i32
    %c0_i32_3 = arith.constant 0 : i32
    %7 = arith.cmpi ne, %6, %c0_i32_3 : i32
    scf.if %7 {
      %cst_22 = arith.constant 0.000000e+00 : f32
      %30 = vector.broadcast %cst_22 : f32 to vector<8x128xf32>
      %c0_23 = arith.constant 0 : index
      %c0_24 = arith.constant 0 : index
      %31 = vector.load %arg7[%c0_23, %c0_24] : memref<8x128xf32, #tpu.memory_space<vmem>>, vector<8x128xf32>
      tpu.vector_store %arg7[%c0_23, %c0_24], %30 {strides = array<i32>} : memref<8x128xf32, #tpu.memory_space<vmem>>, vector<8x128xf32>,
      %cst_25 = arith.constant 0.000000e+00 : f32
      %32 = vector.broadcast %cst_25 : f32 to vector<8x1xf32>
      %c0_26 = arith.constant 0 : index
      %c0_27 = arith.constant 0 : index
      %33 = vector.load %arg8[%c0_26, %c0_27] : memref<8x1xf32, #tpu.memory_space<vmem>>, vector<8x1xf32>
      tpu.vector_store %arg8[%c0_26, %c0_27], %32 {strides = array<i32>} : memref<8x1xf32, #tpu.memory_space<vmem>>, vector<8x1xf32>,
    } else {
    }
    %c0 = arith.constant 0 : index
    %c0_4 = arith.constant 0 : index
    %c0_5 = arith.constant 0 : index
    %8 = vector.load %arg3[%c0, %c0_4, %c0_5] : memref<1x8x128xbf16, #tpu.memory_space<vmem>>, vector<1x8x128xbf16>
    %9 = vector.shape_cast %8 : vector<1x8x128xbf16> to vector<8x128xbf16>
    %c0_6 = arith.constant 0 : index
    %c0_7 = arith.constant 0 : index
    %10 = vector.load %arg8[%c0_6, %c0_7] : memref<8x1xf32, #tpu.memory_space<vmem>>, vector<8x1xf32>
    %11 = arith.extf %9 : vector<8x128xbf16> to vector<8x128xf32>
    %cst = arith.constant dense<0.000000e+00> : vector<8xf32>
    %12 = vector.multi_reduction <add>, %11, %cst [1] : vector<8x128xf32> to vector<8xf32>
    %13 = vector.shape_cast %12 : vector<8xf32> to vector<8x1xf32>
    %14 = arith.addf %10, %13 : vector<8x1xf32>
    %c0_8 = arith.constant 0 : index
    %c0_9 = arith.constant 0 : index
    %15 = vector.load %arg8[%c0_8, %c0_9] : memref<8x1xf32, #tpu.memory_space<vmem>>, vector<8x1xf32>
    tpu.vector_store %arg8[%c0_8, %c0_9], %14 {strides = array<i32>} : memref<8x1xf32, #tpu.memory_space<vmem>>, vector<8x1xf32>,
    %c0_10 = arith.constant 0 : index
    %c0_11 = arith.constant 0 : index
    %16 = vector.load %arg7[%c0_10, %c0_11] : memref<8x128xf32, #tpu.memory_space<vmem>>, vector<8x128xf32>
    %c0_12 = arith.constant 0 : index
    %c0_13 = arith.constant 0 : index
    %c0_14 = arith.constant 0 : index
    %17 = vector.load %arg4[%c0_12, %c0_13, %c0_14] : memref<1x128x128xbf16, #tpu.memory_space<vmem>>, vector<1x128x128xbf16>
    %18 = vector.shape_cast %17 : vector<1x128x128xbf16> to vector<128x128xbf16>
    %cst_15 = arith.constant dense<0.000000e+00> : vector<8x128xf32>
    %19 = tpu.matmul %9, %18, %cst_15 {dimension_numbers = #tpu.dot_dimension_numbers<[1], [0], [0], [1], [0, 0, 1, 1], [], []>} : vector<8x128xbf16>, vector<128x128xbf16>, vector<8x128xf32> -> vector<8x128xf32>
    %20 = arith.addf %16, %19 : vector<8x128xf32>
    %c0_16 = arith.constant 0 : index
    %c0_17 = arith.constant 0 : index
    %21 = vector.load %arg7[%c0_16, %c0_17] : memref<8x128xf32, #tpu.memory_space<vmem>>, vector<8x128xf32>
    tpu.vector_store %arg7[%c0_16, %c0_17], %20 {strides = array<i32>} : memref<8x128xf32, #tpu.memory_space<vmem>>, vector<8x128xf32>,
    %c0_i32_18 = arith.constant 0 : i32
    %22 = arith.cmpi eq, %arg2, %c0_i32_18 : i32
    %23 = arith.extui %22 : i1 to i32
    %c0_i32_19 = arith.constant 0 : i32
    %24 = arith.cmpi ne, %23, %c0_i32_19 : i32
    scf.if %24 {
      %c0_22 = arith.constant 0 : index
      %c0_23 = arith.constant 0 : index
      %30 = vector.load %arg8[%c0_22, %c0_23] : memref<8x1xf32, #tpu.memory_space<vmem>>, vector<8x1xf32>
      %cst_24 = arith.constant 1.000000e+00 : f32
      %31 = vector.broadcast %cst_24 : f32 to vector<8x1xf32>
      %32 = arith.maximumf %30, %31 : vector<8x1xf32>
      %cst_25 = arith.constant 5.000000e-01 : f32
      %33 = vector.broadcast %cst_25 : f32 to vector<8x1xf32>
      %34 = arith.divf %33, %32 : vector<8x1xf32>
      %c0_26 = arith.constant 0 : index
      %c0_27 = arith.constant 0 : index
      %35 = vector.load %arg6[%c0_26, %c0_27] : memref<8x128xf32, #tpu.memory_space<vmem>>, vector<8x128xf32>
      %c0_28 = arith.constant 0 : index
      %c0_29 = arith.constant 0 : index
      %36 = vector.load %arg7[%c0_28, %c0_29] : memref<8x128xf32, #tpu.memory_space<vmem>>, vector<8x128xf32>
      %37 = vector.broadcast %34 : vector<8x1xf32> to vector<8x128xf32>
      %38 = arith.mulf %36, %37 : vector<8x128xf32>
      %39 = arith.addf %35, %38 : vector<8x128xf32>
      %c0_30 = arith.constant 0 : index
      %c0_31 = arith.constant 0 : index
      %40 = vector.load %arg6[%c0_30, %c0_31] : memref<8x128xf32, #tpu.memory_space<vmem>>, vector<8x128xf32>
      tpu.vector_store %arg6[%c0_30, %c0_31], %39 {strides = array<i32>} : memref<8x128xf32, #tpu.memory_space<vmem>>, vector<8x128xf32>,
    } else {
    }
    %c1_i32 = arith.constant 1 : i32
    %25 = arith.cmpi eq, %arg1, %c1_i32 : i32
    %c0_i32_20 = arith.constant 0 : i32
    %26 = arith.cmpi eq, %arg2, %c0_i32_20 : i32
    %27 = arith.andi %25, %26 : i1
    %28 = arith.extui %27 : i1 to i32
    %c0_i32_21 = arith.constant 0 : i32
    %29 = arith.cmpi ne, %28, %c0_i32_21 : i32
    scf.if %29 {
      %c0_22 = arith.constant 0 : index
      %c0_23 = arith.constant 0 : index
      %30 = vector.load %arg6[%c0_22, %c0_23] : memref<8x128xf32, #tpu.memory_space<vmem>>, vector<8x128xf32>
      %c0_24 = arith.constant 0 : index
      %c0_25 = arith.constant 0 : index
      %31 = vector.load %arg5[%c0_24, %c0_25] : memref<8x128xf32, #tpu.memory_space<vmem>>, vector<8x128xf32>
      tpu.vector_store %arg5[%c0_24, %c0_25], %30 {strides = array<i32>} : memref<8x128xf32, #tpu.memory_space<vmem>>, vector<8x128xf32>,
    } else {
    }
    return
  }
  func.func @transform_0(%arg0: i32, %arg1: i32, %arg2: i32) -> (i32, i32, i32) {
    %c0_i32 = arith.constant 0 : i32
    return %arg1, %arg0, %arg2 : i32, i32, i32
  }
  func.func @transform_1(%arg0: i32, %arg1: i32, %arg2: i32) -> (i32, i32, i32) {
    %c0_i32 = arith.constant 0 : i32
    %c0_i32_0 = arith.constant 0 : i32
    return %arg1, %arg2, %c0_i32 : i32, i32, i32
  }
  func.func @transform_2(%arg0: i32, %arg1: i32, %arg2: i32) -> (i32, i32) {
    %c0_i32 = arith.constant 0 : i32
    %c0_i32_0 = arith.constant 0 : i32
    return %arg0, %c0_i32 : i32, i32
  }
}

</mosaic_0001>

<bundles_post_ra>
// kernel: tpu_custom_call.1
= control target key start
LH: loop header
LB: loop body
LE: loop exit
PB: predicated region body
PF: predicated region fallthrough
CT: control target
= control target key end

     0   :  { %7 = vsyncpa [#allocation6], 0  ;;  %s1000_s0 = inlined_call_operand.hbm [shape: bf16[2,8,128], index: 0, kind: input, shape index: {}]   ;;  %s1001_s1 = inlined_call_operand.hbm [shape: bf16[2,128,128], index: 1, kind: input, shape index: {}]   ;;  %s1002_s2 = inlined_call_operand.hbm [shape: f32[8,128], index: 2, kind: output, shape index: {}]  }
   0x1   :  { %9 = vsyncpa [#allocation6 + $0x1], 0 }
   0x2   :  { %10 = vsyncpa [#allocation9], 0 }
   0x3   :  { %12 = vsyncpa [#allocation9 + $0x1], 0 }
   0x4   :  { %13 = vsyncpa [#allocation7], 0  ;;  %s787_s9 = smov 0   ;;  %s789_s10 = smov 0  }
   0x5   :  { %s791_s11 = smov 0   ;;  %s793_s12 = smov 0  }
   0x6   :  { %s795_s13 = smov 0   ;;  %s797_s14 = smov 0  }
   0x7 LB: > { %s476_s15 = sadd.s32 4294967295, %s761_s14   ;;  %s34_s16 = sadd.s32 1, %s757_s13  ;;  %s761_s14 = sphi %s797_s14, %s19_s14   ;;  %s757_s13 = sphi %s795_s13, %s1016_s13   ;;  %s753_s12 = sphi %s793_s12, %s1015_s12   ;;  %s749_s11 = sphi %s791_s11, %s1014_s11   ;;  %s745_s10 = sphi %s789_s10, %s1013_s10   ;;  %s741_s9 = sphi %s787_s9, %s1012_s9  }
   0x8   : > { %p36_p0 = scmp.ge.s32.totalorder %s34_s16, 2  ;;  %s49_s17 = sadd.s32 1, %s749_s11 }
   0x9   : > { %p56_p1 = scmp.ne.s32.totalorder %s749_s11, %s745_s10  ;;  %p57_p2 = scmp.eq.s32.totalorder %s761_s14, 0 }
   0xa   : > { %s1018_s16 = smov (%p36_p0, %s34_s16), 0  ;;  %p62_p4 = scmp.ne.s32.totalorder %s745_s10, %s741_s9 }
   0xb   : > { %p823_p3 = por %p57_p2, %p56_p1  ;;  %s42_s19 = ssub.s32 %s757_s13, %s1018_s16 }
   0xc   : > { %p63_p5 = scmp.eq.s32.totalorder %s476_s15, 0  ;;  %p47_p6 = scmp.eq.s32.totalorder %s42_s19, 0 }
   0xd   : > { %p548_p8 = scmp.lt.s32.totalorder %s761_s14, 2  ;;  %s841_s22 = sand.u32 1, %s749_s11  }
   0xe   : > { %p832_p7 = por %p63_p5, %p62_p4  ;;  %s480_s23 = sshll.u32 %s757_s13, 6 }
   0xf   : > { %s838_s21 = scalar_select %p47_p6, %s749_s11, %s49_s17  }
  0x10   : > { %s1005_s20 = scalar_select %p832_p7, 1, 0 }
  0x11   : > { %s479_s24 = sshll.u32 %s841_s22, 2  ;;  %s848_s27 = scalar_lea.hbm %s1000_s0, %s480_s23 }
  0x12   : > { %s144_s28 = scalar_lea.vmem [#allocation5], %s479_s24  ;;  %p852_p9 = pnand %p548_p8, %p823_p3 }
  0x13   : > { %s153_s29 = sshll.u32 %s144_s28, 4  ;;  %s141_s3 = scalar_lea.sflag [#allocation6], %s841_s22  ;;  %s856_s29 = int_to_ptr.vmem [resolvable:$true] %s153_s29 }
  0x14   : > { %s617_s4 = scalar_lea.hbm %s848_s27, 64  ;;  %p619_p13 = pneg %p852_p9 }
  0x15   : > { %p618_p12 = scmp.ne.s32.totalorder %s848_s27, %s617_s4  ;;  %s622_s7 = scalar_lea.hbm %s1000_s0, 128 }
  0x16   : > { %p623_p2 = scmp.lt.u32.totalorder %s848_s27, %s1000_s0  ;;  %p624_p3 = scmp.lt.u32.totalorder %s622_s7, %s617_s4 }
  0x17   : > { %p620_p0 = pnand %p619_p13, %p618_p12  ;;  %p626_p5 = scmp.lt.u32.totalorder %s617_s4, %s848_s27 }
  0x18   : > { %p625_p4 = por %p624_p3, %p623_p2 }
  0x19   : > { %p621_p1 = pneg %p620_p0 }
  0x1a   : > { %p627_p6 = por %p626_p5, %p625_p4 }
  0x1c   : > { %p628_p8 = pnand %p627_p6, %p621_p1 }
  0x1e   : > { %631 = shalt.err (!%p628_p8)
}
  0x1f   : > { %s632_s17 = scalar_lea.vmem %s856_s29, 64  ;;  %s763_s18 = smov [#allocation5]  }
  0x20   : > { %p633_p12 = scmp.ne.s32.totalorder %s856_s29, %s632_s17  ;;  %s637_s19 = sshll.u32 %s763_s18, 4  ;;  %s638_s19 = int_to_ptr.vmem [resolvable:$false] %s637_s19 }
  0x21   : > { %s639_s23 = scalar_lea.vmem %s638_s19, 128  ;;  %p640_p11 = scmp.lt.s32.totalorder %s856_s29, %s638_s19 }
  0x22   : > { %p635_p0 = pnand %p633_p12, %p619_p13  ;;  %p641_p2 = scmp.lt.s32.totalorder %s639_s23, %s632_s17 }
  0x24   : > { %p636_p10 = pneg %p635_p0  ;;  %p642_p3 = por %p641_p2, %p640_p11 }
  0x26   : > { %p643_p4 = pnand %p642_p3, %p636_p10 }
  0x28   : > { %646 = shalt.err (!%p643_p4)
}
  0x29   : > { %544 = dma.hbm_to_vmem [thread:$0]  (!%p852_p9), %s848_s27, 64, %s856_s29, %s141_s3  }
  0x2a   : > { %p1007_p1 = scmp.lt.s32.totalorder %s761_s14, 3  ;;  %p1008_p5 = scmp.ge.s32.totalorder %s761_s14, 1 }
  0x2b   : > { %s481_s25 = sshll.u32 %s841_s22, 6  ;;  %s501_s26 = sshll.u32 %s757_s13, 10 }
  0x2c   : > { %p890_p6 = pnand %p1008_p5, %p1007_p1  ;;  %s899_s5 = scalar_lea.hbm %s1001_s1, %s501_s26 }
  0x2d   : > { %s164_s6 = scalar_lea.vmem [#allocation8], %s481_s25  ;;  %s161_s27 = scalar_lea.sflag [#allocation9], %s841_s22 }
  0x2e   : > { %s173_s7 = sshll.u32 %s164_s6, 4  ;;  %s647_s29 = scalar_lea.hbm %s899_s5, 1024  ;;  %s901_s7 = int_to_ptr.vmem [resolvable:$true] %s173_s7 }
  0x2f   : > { %p648_p10 = scmp.ne.s32.totalorder %s899_s5, %s647_s29  ;;  %s652_s9 = scalar_lea.hbm %s1001_s1, 2048 }
  0x30   : > { %p653_p12 = scmp.lt.u32.totalorder %s899_s5, %s1001_s1  ;;  %p654_p0 = scmp.lt.u32.totalorder %s652_s9, %s647_s29 }
  0x31   : > { %p650_p11 = pnand %p648_p10, %p619_p13  ;;  %p656_p3 = scmp.lt.u32.totalorder %s647_s29, %s899_s5 }
  0x32   : > { %p655_p2 = por %p654_p0, %p653_p12 }
  0x33   : > { %p651_p8 = pneg %p650_p11 }
  0x34   : > { %p657_p4 = por %p656_p3, %p655_p2 }
  0x36   : > { %p658_p1 = pnand %p657_p4, %p651_p8 }
  0x38   : > { %661 = shalt.err (!%p658_p1)
}
  0x39   : > { %s662_s19 = scalar_lea.vmem %s901_s7, 1024  ;;  %s764_s23 = smov [#allocation8]  }
  0x3a   : > { %p663_p5 = scmp.ne.s32.totalorder %s901_s7, %s662_s19  ;;  %s667_s25 = sshll.u32 %s764_s23, 4  ;;  %s668_s25 = int_to_ptr.vmem [resolvable:$false] %s667_s25 }
  0x3b   : > { %s669_s26 = scalar_lea.vmem %s668_s25, 2048  ;;  %p670_p7 = scmp.lt.s32.totalorder %s901_s7, %s668_s25 }
  0x3c   : > { %p665_p10 = pnand %p663_p5, %p619_p13  ;;  %p671_p12 = scmp.lt.s32.totalorder %s669_s26, %s662_s19 }
  0x3e   : > { %p666_p11 = pneg %p665_p10  ;;  %p672_p0 = por %p671_p12, %p670_p7 }
  0x40   : > { %p673_p2 = pnand %p672_p0, %p666_p11 }
  0x42   : > { %676 = shalt.err (!%p673_p2)
}
  0x43   : > { %s765_s28 = smov 64   ;;  %s766_s4 = smov 4  }
  0x44   : > { %547 = dma.hbm_to_vmem [thread:$0]  (!%p852_p9), %s899_s5, 1024, %s901_s7, %s161_s27, %s765_s28, %s765_s28, %s766_s4  }
  0x45   : > { %185 = sbr.rel (%p890_p6) target bundleno = 425 (0x1a9), region = 28  ;;  %s187_s6 = sand.u32 (!%p890_p6), 1, %s745_s10  }
  0x46   : > { %s485_s29 = sshll.u32 (!%p890_p6), %s187_s6, 2  ;;  %s188_s3 = scalar_lea.sflag (!%p890_p6), [#allocation6], %s187_s6 }
  0x47   : > { %s191_s8 = scalar_lea.vmem (!%p890_p6), [#allocation5], %s485_s29  ;;  %p1010_p7 = scmp.ne.s32.totalorder (!%p890_p6), %s1005_s20, 0 }
  0x4c   : > { %728 = dma.done.wait (%p1010_p7), %s188_s3, 64  }
  0x4d   : > { %730 = vsyncadd (%p1010_p7), %s188_s3, 4294967232  ;;  %s486_s9 = sshll.u32 %s187_s6, 6  ;;  %s197_s17 = scalar_lea.sflag [#allocation9], %s187_s6 }
  0x4e   : > { %s936_s30 = scalar_lea.vmem [#allocation8], %s486_s9 }
  0x4f   : > { %732 = dma.done.wait (%p1010_p7), %s197_s17, 1024  }
  0x50   : > { %734 = vsyncadd (%p1010_p7), %s197_s17, 4294966272  ;;  %p223_p9 = scmp.eq.s32.totalorder %s753_s12, 0 }
  0x51   : > { %v767_v0 = vmov (%p223_p9), 0.0  }
  0x52   : > { %228 = sbr.rel (!%p223_p9) target bundleno = 89 (0x59), region = 40  ;;  %229 = vst [vmem:[#allocation2] sm:$0xff] (%p223_p9), %v767_v0 }
  0x59 PF: > { %v236_v1 = vld [vmem:[%s191_s8] sm:$0xf]  ;;  %v607_v2 = vld [vmem:[%s936_s30] sm:$0xff]   ;;  %v768_v4 = vmov 0.0   ;;  %v608_v5 = vld [vmem:[%s936_s30 + $0x8] sm:$0xff]   ;;  %vm769_vm0 = vmmov 0  }
  0x5a   : > { %v238_v3 = vunpack.c.l.bf16 %v236_v1  ;;  %513 = vmatprep.subr.bf16.mxu0 %v768_v4  ;;  %529 = vmatprep.mubr.msk.bf16.mxu0 %vm769_vm0, %v768_v4  ;;  %v609_v6 = vld [vmem:[%s936_s30 + $0x10] sm:$0xff]   ;;  %vm234_vm1 = vcmask 7168   ;;  %v610_v7 = vld [vmem:[%s936_s30 + $0x18] sm:$0xff]   ;;  %v611_v8 = vld [vmem:[%s936_s30 + $0x20] sm:$0xff]   ;;  %v770_v10 = vmov 0   ;;  %p368_p13 = scmp.eq.s32.totalorder %s753_s12, 1 }
  0x5b   : > { %514 = vmatpush3.bf16.msra.mxu0 %v607_v2  ;;  %235 = vst.msk [vmem:[#allocation4] sm:$0xff] %vm234_vm1, %v768_v4  ;;  %v612_v9 = vld [vmem:[%s936_s30 + $0x28] sm:$0xff]   ;;  %606 = vset.pattern.permute.xlu0 %v770_v10  ;;  %v613_v11 = vld [vmem:[%s936_s30 + $0x30] sm:$0xff]   ;;  %v614_v12 = vld [vmem:[%s936_s30 + $0x38] sm:$0xff]  }
  0x5c   : > { %239 = vadd.xlane.f32.xlu0 %v238_v3  ;;  %515 = vmatprep.subr.bf16.mxu0 %v768_v4  ;;  %v358_v24 = vld [vmem:[#allocation2] sm:$0xff] }
  0x5f   : > { %516 = vmatpush3.bf16.msra.mxu0 %v608_v5 }
  0x60   : > { %517 = vmatprep.subr.bf16.mxu0 %v768_v4 }
  0x62   : > { %v237_v13 = vld [vmem:[#allocation4] sm:$0xff] }
  0x63   : > { %518 = vmatpush3.bf16.msra.mxu0 %v609_v6 }
  0x64   : > { %519 = vmatprep.subr.bf16.mxu0 %v768_v4 }
  0x67   : > { %520 = vmatpush3.bf16.msra.mxu0 %v610_v7 }
  0x68   : > { %521 = vmatprep.subr.bf16.mxu0 %v768_v4 }
  0x6b   : > { %522 = vmatpush3.bf16.msra.mxu0 %v611_v8 }
  0x6c   : > { %523 = vmatprep.subr.bf16.mxu0 %v768_v4 }
  0x6f   : > { %524 = vmatpush3.bf16.msra.mxu0 %v612_v9 }
  0x70   : > { %525 = vmatprep.subr.bf16.mxu0 %v768_v4 }
  0x73   : > { %526 = vmatpush3.bf16.msra.mxu0 %v613_v11 }
  0x74   : > { %527 = vmatprep.subr.bf16.mxu0 %v768_v4 }
  0x77   : > { %528 = vmatpush3.bf16.msra.mxu0 %v614_v12 }
  0x7a   : > { %530 = vmatmul.mubr.bf16.vlgmr.msra.gmra.mrb[0].mxu0 %v236_v1 }
  0xe9   : > { %v240_v14 = vpop.xlane.xlu0 %239 }
  0xea   : > { %v241_v15 = vadd.f32 %v240_v14, %v237_v13 }
  0xec   : > { %243 = vst.msk [vmem:[#allocation4] sm:$0xff] %vm234_vm1, %v241_v15 }
  0xf3   : > { %v354_v16 = vld [vmem:[#allocation4] sm:$0xff] }
  0xf4   : > { %v355_v17 = vmax.f32 %v354_v16, 1.0 }
  0xf6   : > { %615 = vrcp.f32 %v355_v17 }
 0x100   : > { %v616_v18 = vpop.eup %615 }
 0x101   : > { %v357_v19 = vmul.f32 0.5, %v616_v18 }
 0x103   : > { %362 = vperm.xlu0 %606, %v357_v19  }
 0x14d   : > { %v343_v20 = vpop.f32.mrb[0].mxu0 }
 0x14e   : > { %v531_v21 = vpop.f32.mrb[1].mxu0 }
 0x14f   : > { %v346_v22 = vpop.f32.mrb[2].mxu0 }
 0x150   : > { %v532_v23 = vpop.f32.mrb[3].mxu0 }
 0x181   : > { %372 = sbr.rel (!%p368_p13) target bundleno = 400 (0x190), region = 52 }
 0x182   : > { %v363_v25 = vpop.permute.xlu0 %362 }
 0x183   : > { %v365_v26 = vmul.f32 %v363_v25, %v343_v20 }
 0x185   : > { %v366_v27 = vadd.f32 %v365_v26, %v358_v24 }
 0x187   : > { %367 = vst [vmem:[#allocation2] sm:$0xff] %v366_v27 }
 0x18e   : > { %v373_v28 = vld [vmem:[#allocation2] sm:$0xff] }
 0x18f   : > { %374 = vst [vmem:[#allocation10] sm:$0xff] %v373_v28 }
 0x190 PF: > { %p956_p6 = scmp.eq.s32.totalorder %s476_s15, 1  ;;  %s771_s12 = smov [#allocation10]  }
 0x191   : > { %s384_s22 = sshll.u32 %s771_s12, 4  ;;  %s385_s22 = int_to_ptr.vmem [resolvable:$true] %s384_s22 }
 0x192   : > { %s677_s24 = scalar_lea.vmem %s385_s22, 128  ;;  %p684_p1 = scmp.lt.s32.totalorder %s385_s22, %s385_s22 }
 0x193   : > { %p678_p8 = scmp.ne.s32.totalorder %s385_s22, %s677_s24  ;;  %p685_p5 = scmp.lt.s32.totalorder %s677_s24, %s677_s24 }
 0x195   : > { %p679_p3 = pnand %p678_p8, %p956_p6  ;;  %p686_p10 = por %p685_p5, %p684_p1 }
 0x197   : > { %p680_p4 = pneg %p679_p3 }
 0x199   : > { %p687_p11 = pnand %p686_p10, %p680_p4 }
 0x19b   : > { %690 = shalt.err (!%p687_p11)
}
 0x19c   : > { %s691_s15 = scalar_lea.hbm %s1002_s2, 128 }
 0x19d   : > { %p692_p12 = scmp.ne.s32.totalorder %s1002_s2, %s691_s15  ;;  %p697_p7 = scmp.lt.u32.totalorder %s691_s15, %s1002_s2 }
 0x19f   : > { %p693_p0 = pnand %p692_p12, %p956_p6 }
 0x1a1   : > { %p694_p2 = pneg %p693_p0 }
 0x1a3   : > { %p699_p9 = pnand %p697_p7, %p694_p2 }
 0x1a5   : > { %702 = shalt.err (!%p699_p9)
}
 0x1a6   : > { %538 = dma.vmem_to_hbm [thread:$0]  (%p956_p6), %s385_s22, 128, %s1002_s2, [#allocation7]  }
 0x1a7   : > { %736 = dma.done.wait (%p956_p6), [#allocation7], 128  }
 0x1a8   : > { %738 = vsyncadd (%p956_p6), [#allocation7], 4294967168 }
 0x1a9 PF: > { %s19_s14 = sadd.s32 1, %s761_s14   ;;  %s1012_s9 = smov %s745_s10 }
 0x1aa   : > { %p16_p13 = scmp.ge.s32.totalorder %s19_s14, 4   ;;  %s1013_s10 = smov %s749_s11 }
 0x1ab   : > { %s1014_s11 = smov %s838_s21  ;;  %s1015_s12 = smov %s757_s13 }
 0x1ac   : > { %s1016_s13 = smov %s1018_s16  ;;  %18 = sbr.rel (!%p16_p13) target bundleno = 7 (0x7), region = 95 }
 0x1b3   :  { %397 = vsyncpa [#allocation6], 1 }
 0x1b4   :  { %399 = vsyncpa [#allocation6 + $0x1], 1 }
 0x1b5   :  { %400 = vsyncpa [#allocation9], 1 }
 0x1b6   :  { %402 = vsyncpa [#allocation9 + $0x1], 1 }
 0x1b7   :  { %403 = vsyncpa [#allocation7], 1 }
 0x1b8   :  { %405 = vsyncpa [#allocation7 + $0x1], 1 }

</bundles_post_ra>
